<compile_context>
chip_gen: v7x
topology: tpu7x:2x2x1
jax: 0.10.0
libtpu: 0.0.40
codegen_flags: <defaults>
</compile_context>

<pallas_src>
import math

import jax
import jax.numpy as jnp
from jax.experimental import pallas as pl
from jax.experimental.pallas import tpu as pltpu


# ---------------------------------------------------------------------------
# Kernels
# ---------------------------------------------------------------------------

def _make_split_kernel(compute_dtype):
    """a_ref: tanh half, b_ref: sigmoid half; both (tile_rows, h_tile) in VMEM."""
    def kernel(a_ref, b_ref, o_ref):
        a = a_ref[...].astype(compute_dtype)
        b = b_ref[...].astype(compute_dtype)
        # sigmoid(b) == 0.5 * tanh(0.5 * b) + 0.5  -> 2 transcendentals / element
        gate = 0.5 * jnp.tanh(0.5 * b) + 0.5
        o_ref[...] = (jnp.tanh(a) * gate).astype(o_ref.dtype)
    return kernel


def _make_fused_kernel(compute_dtype):
    """Correctness-only fallback: full-width (tile_rows, 2H) block, slice in VMEM."""
    def kernel(x_ref, o_ref):
        h = o_ref.shape[-1]
        a = x_ref[:, :h].astype(compute_dtype)
        b = x_ref[:, h:].astype(compute_dtype)
        gate = 0.5 * jnp.tanh(0.5 * b) + 0.5
        o_ref[...] = (jnp.tanh(a) * gate).astype(o_ref.dtype)
    return kernel


# ---------------------------------------------------------------------------
# Chip-dependent configuration
# ---------------------------------------------------------------------------

def _chip_config():
    kind = ""
    try:
        kind = jax.devices()[0].device_kind.lower()
    except Exception:
        pass
    is_v7 = "v7" in kind
    bf16_ok = is_v7 or ("v6" in kind)        # v5e and older: no bf16 VPU/EUP path
    if is_v7:
        # v7x: 64 MiB physical VMEM, 2 TensorCores -> smaller tiles, >=2 blocks.
        return dict(num_cores=2, bf16_ok=bf16_ok,
                    vmem_target=12 << 20, vmem_floor=24 << 20,
                    vmem_cap=40 << 20, vmem_headroom=6 << 20,
                    max_lane_mult=64, max_tile_rows=2048)
    # v5e / v6e: 128 MiB physical VMEM, 1 TensorCore per chip.
    return dict(num_cores=1, bf16_ok=bf16_ok,
                vmem_target=24 << 20, vmem_floor=32 << 20,
                vmem_cap=48 << 20, vmem_headroom=8 << 20,
                max_lane_mult=64, max_tile_rows=4096)


def _round_up(n, m):
    return ((n + m - 1) // m) * m


def _pick_tile_rows(rows, lane_width, itemsize, pack, cfg):
    # 2 input tiles + 1 output tile, each double-buffered => ~6 * tile bytes.
    budget_rows = cfg["vmem_target"] // max(1, 6 * lane_width * itemsize)
    tile_rows = max(pack, (budget_rows // pack) * pack)
    tile_rows = min(tile_rows, cfg["max_tile_rows"])
    if tile_rows >= rows or rows <= pack:
        tile_rows = rows          # block == full dim is always layout-legal
    return tile_rows


# ---------------------------------------------------------------------------
# Launchers
# ---------------------------------------------------------------------------

def _launch_split(a_arr, b_arr, rows, Hc, b_is_second_half, out_dtype,
                  compute_dtype, cfg):
    """Hc is a multiple of 128. If b_is_second_half, a_arr/b_arr are the same
    (rows, 2*Hc) array and the b half starts at column Hc; otherwise a_arr and
    b_arr are two separate (rows, Hc) arrays."""
    itemsize = jnp.dtype(a_arr.dtype).itemsize
    pack = max(8, 32 // itemsize)       # sublane packing: 8 f32 / 16 bf16 / 32 i8

    n128 = Hc // 128
    mult = min(n128, cfg["max_lane_mult"])
    while n128 % mult:
        mult -= 1
    h_tile = mult * 128
    lane_blocks = Hc // h_tile

    tile_rows = _pick_tile_rows(rows, h_tile, itemsize, pack, cfg)

    # v7x: guarantee >= 2 programs along a 'parallel' axis so both TCs engage.
    if cfg["num_cores"] >= 2 and pl.cdiv(rows, tile_rows) * lane_blocks < 2:
        if rows > pack:
            tile_rows = min(tile_rows, max(pack, _round_up((rows + 1) // 2, pack)))
        elif n128 >= 2:
            mult = n128 // 2
            while n128 % mult:
                mult -= 1
            h_tile = mult * 128
            lane_blocks = Hc // h_tile

    grid = (pl.cdiv(rows, tile_rows), lane_blocks)
    working = 6 * tile_rows * h_tile * itemsize
    vmem_limit = min(max(working + cfg["vmem_headroom"], cfg["vmem_floor"]),
                     cfg["vmem_cap"])

    if b_is_second_half:
        b_spec = pl.BlockSpec((tile_rows, h_tile),
                              lambda i, j, lb=lane_blocks: (i, j + lb))
    else:
        b_spec = pl.BlockSpec((tile_rows, h_tile), lambda i, j: (i, j))

    return pl.pallas_call(
        _make_split_kernel(compute_dtype),
        out_shape=jax.ShapeDtypeStruct((rows, Hc), out_dtype),
        grid_spec=pltpu.PrefetchScalarGridSpec(
            num_scalar_prefetch=0,
            grid=grid,
            in_specs=[pl.BlockSpec((tile_rows, h_tile), lambda i, j: (i, j)),
                      b_spec],
            out_specs=pl.BlockSpec((tile_rows, h_tile), lambda i, j: (i, j)),
        ),
        compiler_params=pltpu.CompilerParams(
            dimension_semantics=("parallel", "parallel"),
            vmem_limit_bytes=vmem_limit),
    )(a_arr, b_arr)


def _launch_fused(x2d, rows, H, out_dtype, compute_dtype, cfg):
    itemsize = jnp.dtype(x2d.dtype).itemsize
    pack = max(8, 32 // itemsize)
    tile_rows = _pick_tile_rows(rows, H, itemsize, pack, cfg)
    if cfg["num_cores"] >= 2 and rows > pack and pl.cdiv(rows, tile_rows) < 2:
        tile_rows = min(tile_rows, max(pack, _round_up((rows + 1) // 2, pack)))
    grid = (pl.cdiv(rows, tile_rows),)
    working = 6 * tile_rows * H * itemsize
    vmem_limit = min(max(working + cfg["vmem_headroom"], cfg["vmem_floor"]),
                     cfg["vmem_cap"])
    return pl.pallas_call(
        _make_fused_kernel(compute_dtype),
        out_shape=jax.ShapeDtypeStruct((rows, H), out_dtype),
        grid_spec=pltpu.PrefetchScalarGridSpec(
            num_scalar_prefetch=0,
            grid=grid,
            in_specs=[pl.BlockSpec((tile_rows, 2 * H), lambda i: (i, 0))],
            out_specs=pl.BlockSpec((tile_rows, H), lambda i: (i, 0)),
        ),
        compiler_params=pltpu.CompilerParams(
            dimension_semantics=("parallel",),
            vmem_limit_bytes=vmem_limit),
    )(x2d)


# ---------------------------------------------------------------------------
# Public wrapper
# ---------------------------------------------------------------------------

def gated_tanh_pallas(x, dim=-1):
    """tanh(x1) * sigmoid(x2) where (x1, x2) = chunk(x, 2, dim)."""
    ndim = x.ndim
    dim = dim % ndim
    shape = x.shape
    c2 = shape[dim]
    assert c2 % 2 == 0, "chunk axis must have even size"
    h = c2 // 2

    rows = math.prod(shape[:dim])
    inner = math.prod(shape[dim + 1:])
    H = h * inner

    # Non-float inputs promote to f32 (matches reference promotion semantics).
    out_dtype = x.dtype if jnp.issubdtype(x.dtype, jnp.floating) else jnp.float32

    # Row-major reshape: chunking along `dim` == splitting the (rows, 2*H) view
    # into its two contiguous column halves. Pure view, no transpose.
    x2d = x.reshape(rows, 2 * H)
    if not jnp.issubdtype(x.dtype, jnp.floating):
        x2d = x2d.astype(jnp.float32)

    cfg = _chip_config()
    compute_dtype = (jnp.bfloat16
                     if (cfg["bf16_ok"] and x2d.dtype == jnp.bfloat16)
                     else jnp.float32)

    if H % 128 == 0:
        out2d = _launch_split(x2d, x2d, rows, H, True, out_dtype,
                              compute_dtype, cfg)
    else:
        H_pad = _round_up(H, 128)
        if H >= 128 and (H_pad - H) * 4 <= H:
            # Pad each half to lane-aligned width and reuse the fast path:
            # lane-dense unmasked stores, no in-kernel non-128 slice relayout.
            pad = H_pad - H
            a2d = jnp.pad(x2d[:, :H], ((0, 0), (0, pad)))
            b2d = jnp.pad(x2d[:, H:], ((0, 0), (0, pad)))
            out2d = _launch_split(a2d, b2d, rows, H_pad, False, out_dtype,
                                  compute_dtype, cfg)[:, :H]
        else:
            # Correctness-only fallback for tiny / very ragged half widths.
            out2d = _launch_fused(x2d, rows, H, out_dtype, compute_dtype, cfg)

    return out2d.reshape(*shape[:dim], h, *shape[dim + 1:])


def gated_tanh_ref(x, dim=-1):
    x_tanh, x_sig = jnp.split(x, 2, axis=dim)
    return jnp.tanh(x_tanh) * jax.nn.sigmoid(x_sig)


if __name__ == "__main__":
    key = jax.random.PRNGKey(0)
    k1, k2, k3, k4, k5 = jax.random.split(key, 5)

    # GatedTanhUnit(dim=-1): (batch=2, seq=8, hidden=2*128) -> (2, 8, 128).
    x1 = jax.random.normal(k1, (2, 8, 256), dtype=jnp.float32)
    o1 = jax.block_until_ready(gated_tanh_pallas(x1, dim=-1))
    r1 = gated_tanh_ref(x1, dim=-1)
    assert o1.shape == r1.shape, (o1.shape, r1.shape)
    assert jnp.allclose(o1, r1, atol=3e-6, rtol=3e-6), "mismatch (dim=-1 aligned)"

    # GatedTanhUnit(dim=1): channel chunk on a conv-style tensor, no transpose.
    x2 = jax.random.normal(k2, (2, 6, 16, 16), dtype=jnp.float32)
    o2 = jax.block_until_ready(gated_tanh_pallas(x2, dim=1))
    r2 = gated_tanh_ref(x2, dim=1)
    assert o2.shape == r2.shape, (o2.shape, r2.shape)
    assert jnp.allclose(o2, r2, atol=3e-6, rtol=3e-6), "mismatch (dim=1)"

    # Ragged H near a 128 multiple -> padded lane-aligned fast path (H=230->256).
    x3 = jax.random.normal(k3, (4, 8, 460), dtype=jnp.float32)
    o3 = jax.block_until_ready(gated_tanh_pallas(x3, dim=-1))
    r3 = gated_tanh_ref(x3, dim=-1)
    assert o3.shape == r3.shape, (o3.shape, r3.shape)
    assert jnp.allclose(o3, r3, atol=3e-6, rtol=3e-6), "mismatch (padded ragged H)"

    # Tiny ragged H -> correctness-only fused fallback path (H=25).
    x4 = jax.random.normal(k4, (4, 8, 50), dtype=jnp.float32)
    o4 = jax.block_until_ready(gated_tanh_pallas(x4, dim=-1))
    r4 = gated_tanh_ref(x4, dim=-1)
    assert o4.shape == r4.shape, (o4.shape, r4.shape)
    assert jnp.allclose(o4, r4, atol=3e-6, rtol=3e-6), "mismatch (small ragged H)"

    # bf16 input: bf16 compute on v6e/v7x, f32 compute on v5e.
    x5 = jax.random.normal(k5, (2, 8, 256), dtype=jnp.float32).astype(jnp.bfloat16)
    o5 = jax.block_until_ready(gated_tanh_pallas(x5, dim=-1))
    r5 = gated_tanh_ref(x5, dim=-1)
    assert o5.shape == r5.shape and o5.dtype == jnp.bfloat16
    assert jnp.allclose(o5.astype(jnp.float32), r5.astype(jnp.float32),
                        atol=3e-2, rtol=3e-2), "mismatch (bf16)"

    print("KERNEL_OK")
</pallas_src>

<mosaic_0001>
module attributes {stable_mosaic.version = 11 : i64} {
  func.func @kernel(%arg0: i32, %arg1: i32, %arg2: memref<16x128xf32, #tpu.memory_space<vmem>>, %arg3: memref<16x128xf32, #tpu.memory_space<vmem>>, %arg4: memref<16x128xf32, #tpu.memory_space<vmem>>) attributes {dimension_semantics = [#tpu.dimension_semantics<parallel>, #tpu.dimension_semantics<parallel>], iteration_bounds = array<i64: 1, 1>, scalar_prefetch = 0 : i64, scratch_operands = 0 : i64, tpu.core_type = #tpu.core_type<tc>, window_params = [{transform_indices = @transform_0, window_bounds = array<i64: 16, 128>}, {transform_indices = @transform_1, window_bounds = array<i64: 16, 128>}, {transform_indices = @transform_2, window_bounds = array<i64: 16, 128>}]} {
    %c0 = arith.constant 0 : index
    %c0_0 = arith.constant 0 : index
    %0 = vector.load %arg2[%c0, %c0_0] : memref<16x128xf32, #tpu.memory_space<vmem>>, vector<16x128xf32>
    %c0_1 = arith.constant 0 : index
    %c0_2 = arith.constant 0 : index
    %1 = vector.load %arg3[%c0_1, %c0_2] : memref<16x128xf32, #tpu.memory_space<vmem>>, vector<16x128xf32>
    %cst = arith.constant 5.000000e-01 : f32
    %2 = vector.broadcast %cst : f32 to vector<16x128xf32>
    %3 = arith.mulf %2, %1 : vector<16x128xf32>
    %4 = math.tanh %3 : vector<16x128xf32>
    %cst_3 = arith.constant 5.000000e-01 : f32
    %5 = vector.broadcast %cst_3 : f32 to vector<16x128xf32>
    %6 = arith.mulf %5, %4 : vector<16x128xf32>
    %cst_4 = arith.constant 5.000000e-01 : f32
    %7 = vector.broadcast %cst_4 : f32 to vector<16x128xf32>
    %8 = arith.addf %6, %7 : vector<16x128xf32>
    %9 = math.tanh %0 : vector<16x128xf32>
    %10 = arith.mulf %9, %8 : vector<16x128xf32>
    %c0_5 = arith.constant 0 : index
    %c0_6 = arith.constant 0 : index
    %11 = vector.load %arg4[%c0_5, %c0_6] : memref<16x128xf32, #tpu.memory_space<vmem>>, vector<16x128xf32>
    tpu.vector_store %arg4[%c0_5, %c0_6], %10 {strides = array<i32>} : memref<16x128xf32, #tpu.memory_space<vmem>>, vector<16x128xf32>,
    return
  }
  func.func @transform_0(%arg0: i32, %arg1: i32) -> (i32, i32) {
    %c0_i32 = arith.constant 0 : i32
    return %arg0, %arg1 : i32, i32
  }
  func.func @transform_1(%arg0: i32, %arg1: i32) -> (i32, i32) {
    %c1_i32 = arith.constant 1 : i32
    %0 = arith.addi %arg1, %c1_i32 : i32
    %c0_i32 = arith.constant 0 : i32
    return %arg0, %0 : i32, i32
  }
  func.func @transform_2(%arg0: i32, %arg1: i32) -> (i32, i32) {
    %c0_i32 = arith.constant 0 : i32
    return %arg0, %arg1 : i32, i32
  }
}

</mosaic_0001>

<bundles_post_ra>
// kernel: tpu_custom_call.1
= control target key start
LH: loop header
LB: loop body
LE: loop exit
PB: predicated region body
PF: predicated region fallthrough
CT: control target
= control target key end

     0   :  { %7 = vsyncpa [#allocation3], 0  ;;  %s237_s0 = inlined_call_operand.hbm [shape: f32[16,256], index: 0, kind: input, shape index: {}]   ;;  %s238_s1 = inlined_call_operand.hbm [shape: f32[16,256], index: 1, kind: input, shape index: {}]   ;;  %s239_s2 = inlined_call_operand.hbm [shape: f32[16,128], index: 2, kind: output, shape index: {}]  }
   0x1   :  { %8 = vsyncpa [#allocation6], 0 }
   0x2   :  { %9 = vsyncpa [#allocation4], 0  ;;  %s170_s9 = smov [#allocation2]   ;;  %s95_s13 = scalar_lea.hbm %s237_s0, 256 }
   0x3   :  { %s15_s10 = sshll.u32 %s170_s9, 4  ;;  %p96_p0 = scmp.ne.s32.totalorder %s237_s0, %s95_s13  ;;  %s16_s10 = int_to_ptr.vmem [resolvable:$true] %s15_s10 }
   0x4   :  { %s97_s18 = scalar_lea.hbm %s237_s0, 512  ;;  %p99_p2 = scmp.lt.u32.totalorder %s95_s13, %s237_s0 }
   0x5   :  { %p98_p1 = scmp.lt.u32.totalorder %s97_s18, %s95_s13 }
   0x7   :  { %p100_p3 = por %p99_p2, %p98_p1 }
   0x9   :  { %p101_p4 = pnand %p100_p3, %p96_p0 }
   0xb   :  { %104 = shalt.err (!%p101_p4)
}
   0xc   :  { %s105_s21 = scalar_lea.vmem %s16_s10, 256  ;;  %p110_p6 = scmp.lt.s32.totalorder %s16_s10, %s16_s10 }
   0xd   :  { %p106_p5 = scmp.ne.s32.totalorder %s16_s10, %s105_s21  ;;  %p111_p7 = scmp.lt.s32.totalorder %s105_s21, %s105_s21 }
   0xf   :  { %p112_p8 = por %p111_p7, %p110_p6 }
  0x11   :  { %p113_p9 = pnand %p112_p8, %p106_p5 }
  0x13   :  { %116 = shalt.err (!%p113_p9)
}
  0x14   :  { %s171_s22 = smov 256   ;;  %s172_s23 = smov 128  }
  0x15   :  { %s173_s24 = smov 8   ;;  %s80_s29 = scalar_lea.hbm %s238_s1, 128 }
  0x16   :  { %21 = dma.hbm_to_vmem [thread:$0]  %s237_s0, 256, %s16_s10, [#allocation3], %s171_s22, %s172_s23, %s173_s24  }
  0x17   :  { %s174_s30 = smov [#allocation5]   ;;  %s141_s6 = scalar_lea.hbm %s238_s1, 384 }
  0x18   :  { %s30_s3 = sshll.u32 %s174_s30, 4  ;;  %p118_p10 = scmp.ne.s32.totalorder %s80_s29, %s141_s6  ;;  %s31_s3 = int_to_ptr.vmem [resolvable:$true] %s30_s3 }
  0x19   :  { %s119_s9 = scalar_lea.hbm %s238_s1, 512  ;;  %p120_p11 = scmp.lt.u32.totalorder %s80_s29, %s238_s1 }
  0x1a   :  { %p121_p12 = scmp.lt.u32.totalorder %s119_s9, %s141_s6  ;;  %p123_p0 = scmp.lt.u32.totalorder %s141_s6, %s80_s29 }
  0x1c   :  { %p122_p13 = por %p121_p12, %p120_p11 }
  0x1e   :  { %p124_p1 = por %p123_p0, %p122_p13 }
  0x20   :  { %p125_p2 = pnand %p124_p1, %p118_p10 }
  0x22   :  { %128 = shalt.err (!%p125_p2)
}
  0x23   :  { %s129_s0 = scalar_lea.vmem %s31_s3, 256  ;;  %p134_p4 = scmp.lt.s32.totalorder %s31_s3, %s31_s3 }
  0x24   :  { %p130_p3 = scmp.ne.s32.totalorder %s31_s3, %s129_s0  ;;  %p135_p5 = scmp.lt.s32.totalorder %s129_s0, %s129_s0 }
  0x26   :  { %p136_p6 = por %p135_p5, %p134_p4 }
  0x28   :  { %p137_p7 = pnand %p136_p6, %p130_p3 }
  0x2a   :  { %140 = shalt.err (!%p137_p7)
}
  0x2b   :  { %36 = dma.hbm_to_vmem [thread:$0]  %s80_s29, 256, %s31_s3, [#allocation6], %s171_s22, %s172_s23, %s173_s24  }
  0x2c   :  { %164 = dma.done.wait [#allocation3], 256  }
  0x2d   :  { %165 = vsyncadd [#allocation3], 4294967040 }
  0x2e   :  { %166 = dma.done.wait [#allocation6], 256  }
  0x2f   :  { %167 = vsyncadd [#allocation6], 4294967040  ;;  %v46_v0 = vld [vmem:[#allocation5] sm:$0xff]  ;;  %v47_v2 = vld [vmem:[#allocation5 + $0x8] sm:$0xff]  ;;  %s175_s1 = smov [#allocation7]  }
  0x30   :  { %v48_v1 = vmul.f32 0.5, %v46_v0  ;;  %v44_v3 = vld [vmem:[#allocation2] sm:$0xff]  ;;  %v49_v4 = vmul.f32 0.5, %v47_v2  ;;  %v45_v5 = vld [vmem:[#allocation2 + $0x8] sm:$0xff]  ;;  %s67_s10 = sshll.u32 %s175_s1, 4  ;;  %s68_s10 = int_to_ptr.vmem [resolvable:$true] %s67_s10 }
  0x31   :  { %s142_s13 = scalar_lea.vmem %s68_s10, 256  ;;  %p147_p9 = scmp.lt.s32.totalorder %s68_s10, %s68_s10 }
  0x32   :  { %87 = vtanh.f32 %v48_v1  ;;  %p143_p8 = scmp.ne.s32.totalorder %s68_s10, %s142_s13  ;;  %p148_p10 = scmp.lt.s32.totalorder %s142_s13, %s142_s13 }
  0x33   :  { %89 = vtanh.f32 %v49_v4 }
  0x34   :  { %91 = vtanh.f32 %v44_v3  ;;  %p149_p11 = por %p148_p10, %p147_p9 }
  0x35   :  { %93 = vtanh.f32 %v45_v5 }
  0x36   :  { %p150_p12 = pnand %p149_p11, %p143_p8 }
  0x3c   :  { %v88_v6 = vpop.eup %87 }
  0x3d   :  { %v90_v7 = vpop.eup %89  ;;  %v52_v8 = vmul.f32 0.5, %v88_v6 }
  0x3e   :  { %v92_v9 = vpop.eup %91  ;;  %v53_v10 = vmul.f32 0.5, %v90_v7 }
  0x3f   :  { %v94_v11 = vpop.eup %93  ;;  %v54_v12 = vadd.f32 0.5, %v52_v8 }
  0x40   :  { %v55_v13 = vadd.f32 0.5, %v53_v10 }
  0x41   :  { %v58_v14 = vmul.f32 %v92_v9, %v54_v12 }
  0x42   :  { %v59_v15 = vmul.f32 %v94_v11, %v55_v13 }
  0x43   :  { %60 = vst [vmem:[#allocation7] sm:$0xff] %v58_v14 }
  0x44   :  { %61 = vst [vmem:[#allocation7 + $0x8] sm:$0xff] %v59_v15 }
  0x45   :  { %153 = shalt.err (!%p150_p12)
}
  0x46   :  { %s154_s16 = scalar_lea.hbm %s239_s2, 256 }
  0x47   :  { %p155_p13 = scmp.ne.s32.totalorder %s239_s2, %s154_s16  ;;  %p158_p0 = scmp.lt.u32.totalorder %s154_s16, %s239_s2 }
  0x49   :  { %p160_p1 = pnand %p158_p0, %p155_p13 }
  0x4b   :  { %163 = shalt.err (!%p160_p1)
}
  0x4c   :  { %73 = dma.vmem_to_hbm [thread:$0]  %s68_s10, 256, %s239_s2, [#allocation4], %s172_s23, %s172_s23, %s173_s24  }
  0x4d   :  { %168 = dma.done.wait [#allocation4], 256  }
  0x4e   :  { %169 = vsyncadd [#allocation4], 4294967040 }
  0x4f   :  { %77 = vsyncpa [#allocation3], 1 }
  0x50   :  { %78 = vsyncpa [#allocation6], 1 }
  0x51   :  { %79 = vsyncpa [#allocation4], 1 }

</bundles_post_ra>
